<compile_context>
chip_gen: v7x
topology: tpu7x:2x2x1
jax: 0.10.0
libtpu: 0.0.40
codegen_flags: <defaults>
</compile_context>

<pallas_src>
import jax
import jax.numpy as jnp
from jax.experimental import pallas as pl
from jax.experimental.pallas import tpu as pltpu


def _round_up(x, m):
    return ((x + m - 1) // m) * m


def _sublane_align(dtype):
    # Minimum second-to-last-dim multiple by packing: f32 -> 8, bf16 -> 16,
    # int8/fp8 -> 32.
    return {4: 8, 2: 16, 1: 32}.get(jnp.dtype(dtype).itemsize, 8)


def _pick_tile(dim, target, align):
    """Largest tile <= target that is a multiple of `align` and divides `dim`.

    Returns the full extent if dim <= target (full-dim blocks are exempt from
    the (8,128) divisibility constraint). Falls back to the aligned target
    (caller pads) only for ragged dims with no suitable divisor.
    """
    if dim <= target:
        return dim
    t = (target // align) * align
    while t >= align:
        if dim % t == 0:
            return t
        t -= align
    return max((target // align) * align, align)


def _hw_config():
    """Generation-aware tile targets and scoped-VMEM request."""
    try:
        kind = jax.devices()[0].device_kind.lower()
    except Exception:
        kind = ""
    if "v7" in kind:
        # 64 MiB physical VMEM per TensorCore: keep tiles + budget modest.
        return dict(tm=512, tn=512, tk=1024, vmem=48 * 1024 * 1024)
    if "v5" in kind or "v6" in kind:
        # 128 MiB physical VMEM: larger resident panels halve HBM re-reads.
        return dict(tm=1024, tn=1024, tk=1024, vmem=96 * 1024 * 1024)
    # Unknown generation: stay v7x-safe.
    return dict(tm=512, tn=512, tk=1024, vmem=48 * 1024 * 1024)


# ---------------------------------------------------------------------------
# Kernels
# ---------------------------------------------------------------------------
def _matmul_kernel_single_k(x_ref, w_ref, o_ref):
    # Whole K reduction in one MXU pass; no accumulator scratch needed.
    o_ref[...] = jnp.dot(
        x_ref[...], w_ref[...], preferred_element_type=jnp.float32
    ).astype(o_ref.dtype)


def _matmul_kernel_acc(x_ref, w_ref, o_ref, acc_ref):
    # K is the innermost ("arbitrary") grid axis; o_ref / acc_ref stay
    # resident across it. Accumulate in f32, cast once on the last K step.
    @pl.when(pl.program_id(2) == 0)
    def _():
        acc_ref[...] = jnp.zeros_like(acc_ref)

    acc_ref[...] += jnp.dot(
        x_ref[...], w_ref[...], preferred_element_type=jnp.float32
    )

    @pl.when(pl.program_id(2) == pl.num_programs(2) - 1)
    def _():
        o_ref[...] = acc_ref[...].astype(o_ref.dtype)


# ---------------------------------------------------------------------------
# Wrapper
# ---------------------------------------------------------------------------
@jax.jit
def embedding_forward(x, param):
    """Pallas implementation of Embedding.forward: matmul(x, param).

    x:     (batch, seq, input_dim)
    param: (input_dim, embedding_dim)
    returns (batch, seq, embedding_dim) in the promoted dtype.
    """
    batch, seq, input_dim = x.shape
    k_dim, embedding_dim = param.shape
    assert k_dim == input_dim

    M, K, N = batch * seq, input_dim, embedding_dim
    out_dtype = jnp.result_type(x.dtype, param.dtype)
    x2d = x.reshape(M, K)

    cfg = _hw_config()
    tm_align = max(_sublane_align(x.dtype), _sublane_align(out_dtype))

    tm = _pick_tile(M, cfg["tm"], tm_align)
    tn = _pick_tile(N, cfg["tn"], 128)
    tk = _pick_tile(K, cfg["tk"], 128)

    # Pad only if a ragged dim forced a non-dividing tile (rare fallback).
    Mp, Kp, Np = _round_up(M, tm), _round_up(K, tk), _round_up(N, tn)
    if Mp != M or Kp != K:
        x2d = jnp.pad(x2d, ((0, Mp - M), (0, Kp - K)))
    wp = param
    if Kp != K or Np != N:
        wp = jnp.pad(param, ((0, Kp - K), (0, Np - N)))

    mg, ng, kg = Mp // tm, Np // tn, Kp // tk

    cost = pl.CostEstimate(
        flops=2 * M * N * K,
        transcendentals=0,
        bytes_accessed=(
            x.dtype.itemsize * Mp * Kp * ng          # x row-panels, re-streamed per N tile
            + param.dtype.itemsize * Kp * Np * mg    # param col-panels, re-streamed per M tile
            + jnp.dtype(out_dtype).itemsize * Mp * Np
        ),
    )

    if kg == 1:
        # Full-K blocks: 2-D grid, no K loop, no accumulator scratch.
        # "parallel" axes let v7x shard M/N blocks across its TensorCores.
        grid_spec = pltpu.PrefetchScalarGridSpec(
            num_scalar_prefetch=0,
            grid=(mg, ng),
            in_specs=[
                pl.BlockSpec((tm, Kp), lambda i, j: (i, 0)),
                pl.BlockSpec((Kp, tn), lambda i, j: (0, j)),
            ],
            out_specs=pl.BlockSpec((tm, tn), lambda i, j: (i, j)),
        )
        kernel = _matmul_kernel_single_k
        dim_sem = ("parallel", "parallel")
    else:
        # K-streamed path: K innermost/"arbitrary", output block resident,
        # f32 accumulation in VMEM scratch, cast once at the end.
        grid_spec = pltpu.PrefetchScalarGridSpec(
            num_scalar_prefetch=0,
            grid=(mg, ng, kg),
            in_specs=[
                pl.BlockSpec((tm, tk), lambda i, j, kk: (i, kk)),
                pl.BlockSpec((tk, tn), lambda i, j, kk: (kk, j)),
            ],
            out_specs=pl.BlockSpec((tm, tn), lambda i, j, kk: (i, j)),
            scratch_shapes=[pltpu.VMEM((tm, tn), jnp.float32)],
        )
        kernel = _matmul_kernel_acc
        dim_sem = ("parallel", "parallel", "arbitrary")

    outp = pl.pallas_call(
        kernel,
        out_shape=jax.ShapeDtypeStruct((Mp, Np), out_dtype),
        grid_spec=grid_spec,
        compiler_params=pltpu.CompilerParams(
            dimension_semantics=dim_sem,
            vmem_limit_bytes=cfg["vmem"],
        ),
        cost_estimate=cost,
    )(x2d, wp)

    out2d = outp[:M, :N] if (Mp != M or Np != N) else outp
    return out2d.reshape(batch, seq, N)


if __name__ == "__main__":
    # Small shapes consistent with the module: batch=2, seq=8,
    # input_dim=256, embedding_dim=128.
    batch, seq, input_dim, embedding_dim = 2, 8, 256, 128

    key = jax.random.PRNGKey(0)
    kx, kp = jax.random.split(key)
    x = jax.random.normal(kx, (batch, seq, input_dim), dtype=jnp.float32)
    # Deterministic init mirroring torch.randn(input_dim, embedding_dim).
    param = jax.random.normal(kp, (input_dim, embedding_dim), dtype=jnp.float32)

    out = embedding_forward(x, param)
    out = jax.block_until_ready(out)

    # Correctness check against plain-JAX reference.
    ref = jnp.matmul(x, param)
    assert out.shape == (batch, seq, embedding_dim)
    assert jnp.allclose(out, ref, atol=1e-4, rtol=1e-4)

    print("KERNEL_OK")
</pallas_src>

<mosaic_0001>
module attributes {stable_mosaic.version = 11 : i64} {
  func.func @_matmul_kernel_single_k(%arg0: i32, %arg1: i32, %arg2: memref<16x256xf32, #tpu.memory_space<vmem>>, %arg3: memref<256x128xf32, #tpu.memory_space<vmem>>, %arg4: memref<16x128xf32, #tpu.memory_space<vmem>>) attributes {dimension_semantics = [#tpu.dimension_semantics<parallel>, #tpu.dimension_semantics<parallel>], iteration_bounds = array<i64: 1, 1>, scalar_prefetch = 0 : i64, scratch_operands = 0 : i64, tpu.core_type = #tpu.core_type<tc>, window_params = [{transform_indices = @transform_0, window_bounds = array<i64: 16, 256>}, {transform_indices = @transform_1, window_bounds = array<i64: 256, 128>}, {transform_indices = @transform_2, window_bounds = array<i64: 16, 128>}]} {
    %c0 = arith.constant 0 : index
    %c0_0 = arith.constant 0 : index
    %0 = vector.load %arg2[%c0, %c0_0] : memref<16x256xf32, #tpu.memory_space<vmem>>, vector<16x256xf32>
    %c0_1 = arith.constant 0 : index
    %c0_2 = arith.constant 0 : index
    %1 = vector.load %arg3[%c0_1, %c0_2] : memref<256x128xf32, #tpu.memory_space<vmem>>, vector<256x128xf32>
    %cst = arith.constant dense<0.000000e+00> : vector<16x128xf32>
    %2 = tpu.matmul %0, %1, %cst {dimension_numbers = #tpu.dot_dimension_numbers<[1], [0], [0], [1], [0, 0, 1, 1], [], []>} : vector<16x256xf32>, vector<256x128xf32>, vector<16x128xf32> -> vector<16x128xf32>
    %c0_3 = arith.constant 0 : index
    %c0_4 = arith.constant 0 : index
    %3 = vector.load %arg4[%c0_3, %c0_4] : memref<16x128xf32, #tpu.memory_space<vmem>>, vector<16x128xf32>
    tpu.vector_store %arg4[%c0_3, %c0_4], %2 {strides = array<i32>} : memref<16x128xf32, #tpu.memory_space<vmem>>, vector<16x128xf32>,
    return
  }
  func.func @transform_0(%arg0: i32, %arg1: i32) -> (i32, i32) {
    %c0_i32 = arith.constant 0 : i32
    %c0_i32_0 = arith.constant 0 : i32
    return %arg0, %c0_i32 : i32, i32
  }
  func.func @transform_1(%arg0: i32, %arg1: i32) -> (i32, i32) {
    %c0_i32 = arith.constant 0 : i32
    %c0_i32_0 = arith.constant 0 : i32
    return %c0_i32, %arg1 : i32, i32
  }
  func.func @transform_2(%arg0: i32, %arg1: i32) -> (i32, i32) {
    %c0_i32 = arith.constant 0 : i32
    return %arg0, %arg1 : i32, i32
  }
}

</mosaic_0001>

<bundles_post_ra>
// kernel: embedding_forward.1
= control target key start
LH: loop header
LB: loop body
LE: loop exit
PB: predicated region body
PF: predicated region fallthrough
CT: control target
= control target key end

     0   :  { %7 = vsyncpa [#allocation3], 0  ;;  %s400_s0 = inlined_call_operand.hbm [shape: f32[16,256], index: 0, kind: input, shape index: {}]   ;;  %s401_s1 = inlined_call_operand.hbm [shape: f32[256,128], index: 1, kind: input, shape index: {}]   ;;  %s402_s2 = inlined_call_operand.hbm [shape: f32[16,128], index: 2, kind: output, shape index: {}]  }
   0x1   :  { %8 = vsyncpa [#allocation6], 0 }
   0x2   :  { %9 = vsyncpa [#allocation4], 0  ;;  %s336_s9 = smov [#allocation2]   ;;  %s264_s13 = scalar_lea.hbm %s400_s0, 512 }
   0x3   :  { %s15_s10 = sshll.u32 %s336_s9, 4  ;;  %p265_p0 = scmp.ne.s32.totalorder %s400_s0, %s264_s13  ;;  %s16_s10 = int_to_ptr.vmem [resolvable:$true] %s15_s10 }
   0x4   :  { %p268_p1 = scmp.lt.u32.totalorder %s264_s13, %s400_s0 }
   0x6   :  { %p270_p2 = pnand %p268_p1, %p265_p0 }
   0x8   :  { %273 = shalt.err (!%p270_p2)
}
   0x9   :  { %s274_s18 = scalar_lea.vmem %s16_s10, 512  ;;  %p279_p4 = scmp.lt.s32.totalorder %s16_s10, %s16_s10 }
   0xa   :  { %p275_p3 = scmp.ne.s32.totalorder %s16_s10, %s274_s18  ;;  %p280_p5 = scmp.lt.s32.totalorder %s274_s18, %s274_s18 }
   0xc   :  { %p281_p6 = por %p280_p5, %p279_p4 }
   0xe   :  { %p282_p7 = pnand %p281_p6, %p275_p3 }
  0x10   :  { %285 = shalt.err (!%p282_p7)
}
  0x11   :  { %s337_s19 = smov 256   ;;  %s338_s20 = smov 16  }
  0x12   :  { %21 = dma.hbm_to_vmem [thread:$0]  %s400_s0, 512, %s16_s10, [#allocation3], %s337_s19, %s337_s19, %s338_s20  }
  0x13   :  { %s339_s23 = smov [#allocation5]   ;;  %s286_s27 = scalar_lea.hbm %s401_s1, 4096 }
  0x14   :  { %s27_s24 = sshll.u32 %s339_s23, 4  ;;  %p287_p8 = scmp.ne.s32.totalorder %s401_s1, %s286_s27  ;;  %s28_s24 = int_to_ptr.vmem [resolvable:$true] %s27_s24 }
  0x15   :  { %p290_p9 = scmp.lt.u32.totalorder %s286_s27, %s401_s1 }
  0x17   :  { %p292_p10 = pnand %p290_p9, %p287_p8 }
  0x19   :  { %295 = shalt.err (!%p292_p10)
}
  0x1a   :  { %s296_s4 = scalar_lea.vmem %s28_s24, 4096  ;;  %p301_p12 = scmp.lt.s32.totalorder %s28_s24, %s28_s24 }
  0x1b   :  { %p297_p11 = scmp.ne.s32.totalorder %s28_s24, %s296_s4  ;;  %p302_p13 = scmp.lt.s32.totalorder %s296_s4, %s296_s4 }
  0x1d   :  { %p303_p0 = por %p302_p13, %p301_p12 }
  0x1f   :  { %p304_p1 = pnand %p303_p0, %p297_p11 }
  0x21   :  { %307 = shalt.err (!%p304_p1)
}
  0x22   :  { %s340_s0 = smov 128   ;;  %s341_s5 = smov 8  }
  0x23   :  { %33 = dma.hbm_to_vmem [thread:$0]  %s401_s1, 4096, %s28_s24, [#allocation6], %s340_s0, %s340_s0, %s341_s5  }
  0x24   :  { %330 = dma.done.wait [#allocation3], 512  }
  0x25   :  { %331 = vsyncadd [#allocation3], 4294966784 }
  0x26   :  { %332 = dma.done.wait [#allocation6], 4096  }
  0x27   :  { %333 = vsyncadd [#allocation6], 4294963200  ;;  %v60_v0 = vld [vmem:[#allocation5 + $0x80] sm:$0xff]  ;;  %v61_v1 = vld [vmem:[#allocation5 + $0x88] sm:$0xff]  ;;  %s342_s1 = smov [#allocation7]  }
  0x28   :  { %v44_v2 = vld [vmem:[#allocation5] sm:$0xff]  ;;  %v209_v3 = vpack.c.bf16 %v61_v1, %v60_v0  ;;  %v45_v4 = vld [vmem:[#allocation5 + $0x8] sm:$0xff]  ;;  %v62_v5 = vld [vmem:[#allocation5 + $0x90] sm:$0xff]  ;;  %s158_s8 = sshll.u32 %s342_s1, 4  ;;  %s159_s8 = int_to_ptr.vmem [resolvable:$true] %s158_s8 }
  0x29   :  { %v63_v6 = vld [vmem:[#allocation5 + $0x98] sm:$0xff]  ;;  %v211_v7 = vpack.c.bf16 %v45_v4, %v44_v2  ;;  %v46_v9 = vld [vmem:[#allocation5 + $0x10] sm:$0xff]  ;;  %v64_v11 = vld [vmem:[#allocation5 + $0xa0] sm:$0xff]  ;;  %s308_s9 = scalar_lea.vmem %s159_s8, 256  ;;  %p313_p3 = scmp.lt.s32.totalorder %s159_s8, %s159_s8 }
  0x2a   :  { %v213_v8 = vpack.c.bf16 %v63_v6, %v62_v5  ;;  %v47_v10 = vld [vmem:[#allocation5 + $0x18] sm:$0xff]  ;;  %210 = vmatprep.subr.bf16.mxu0 %v209_v3  ;;  %241 = vmatprep.subr.bf16.mxu1 %v209_v3  ;;  %v65_v12 = vld [vmem:[#allocation5 + $0xa8] sm:$0xff]  ;;  %v48_v15 = vld [vmem:[#allocation5 + $0x20] sm:$0xff]  ;;  %p309_p2 = scmp.ne.s32.totalorder %s159_s8, %s308_s9  ;;  %p314_p4 = scmp.lt.s32.totalorder %s308_s9, %s308_s9 }
  0x2b   :  { %212 = vmatpush3.bf16.msra.mxu0 %v211_v7  ;;  %249 = vmatpush3.bf16.msra.mxu1 %v211_v7  ;;  %v215_v13 = vpack.c.bf16 %v47_v10, %v46_v9  ;;  %v217_v14 = vpack.c.bf16 %v65_v12, %v64_v11  ;;  %v49_v16 = vld [vmem:[#allocation5 + $0x28] sm:$0xff]  ;;  %v66_v17 = vld [vmem:[#allocation5 + $0xb0] sm:$0xff]  ;;  %v67_v18 = vld [vmem:[#allocation5 + $0xb8] sm:$0xff] }
  0x2c   :  { %214 = vmatprep.subr.bf16.mxu0 %v213_v8  ;;  %242 = vmatprep.subr.bf16.mxu1 %v213_v8  ;;  %v219_v19 = vpack.c.bf16 %v49_v16, %v48_v15  ;;  %v221_v20 = vpack.c.bf16 %v67_v18, %v66_v17  ;;  %v50_v21 = vld [vmem:[#allocation5 + $0x30] sm:$0xff]  ;;  %v51_v22 = vld [vmem:[#allocation5 + $0x38] sm:$0xff]  ;;  %v68_v23 = vld [vmem:[#allocation5 + $0xc0] sm:$0xff]  ;;  %p315_p5 = por %p314_p4, %p313_p3 }
  0x2d   :  { %v69_v24 = vld [vmem:[#allocation5 + $0xc8] sm:$0xff]  ;;  %v43_v26 = vld [vmem:[#allocation2 + $0x18] sm:$0xff]  ;;  %v223_v27 = vpack.c.bf16 %v51_v22, %v50_v21  ;;  %v52_v29 = vld [vmem:[#allocation5 + $0x40] sm:$0xff] }
  0x2e   :  { %v41_v25 = vld [vmem:[#allocation2 + $0x8] sm:$0xff]  ;;  %v225_v28 = vpack.c.bf16 %v69_v24, %v68_v23  ;;  %v70_v31 = vld [vmem:[#allocation5 + $0xd0] sm:$0xff]  ;;  %v71_v32 = vld [vmem:[#allocation5 + $0xd8] sm:$0xff]  ;;  %145 = vmatprep.mubr.f32.mxu1 %v43_v26  ;;  %p316_p6 = pnand %p315_p5, %p309_p2 }
  0x2f   :  { %216 = vmatpush3.bf16.msra.mxu0 %v215_v13  ;;  %250 = vmatpush3.bf16.msra.mxu1 %v215_v13  ;;  %v53_v30 = vld [vmem:[#allocation5 + $0x48] sm:$0xff]  ;;  %v229_v34 = vpack.c.bf16 %v71_v32, %v70_v31  ;;  %v54_v35 = vld [vmem:[#allocation5 + $0x50] sm:$0xff]  ;;  %v55_v36 = vld [vmem:[#allocation5 + $0x58] sm:$0xff] }
  0x30   :  { %218 = vmatprep.subr.bf16.mxu0 %v217_v14  ;;  %243 = vmatprep.subr.bf16.mxu1 %v217_v14  ;;  %v227_v33 = vpack.c.bf16 %v53_v30, %v52_v29  ;;  %v72_v37 = vld [vmem:[#allocation5 + $0xe0] sm:$0xff]  ;;  %v73_v38 = vld [vmem:[#allocation5 + $0xe8] sm:$0xff]  ;;  %v231_v39 = vpack.c.bf16 %v55_v36, %v54_v35  ;;  %v74_v43 = vld [vmem:[#allocation5 + $0xf0] sm:$0xff] }
  0x31   :  { %140 = vmatprep.mubr.f32.mxu0 %v41_v25  ;;  %v233_v40 = vpack.c.bf16 %v73_v38, %v72_v37  ;;  %v56_v41 = vld [vmem:[#allocation5 + $0x60] sm:$0xff]  ;;  %v57_v42 = vld [vmem:[#allocation5 + $0x68] sm:$0xff]  ;;  %v75_v44 = vld [vmem:[#allocation5 + $0xf8] sm:$0xff] }
  0x32   :  { %v235_v45 = vpack.c.bf16 %v57_v42, %v56_v41  ;;  %v237_v46 = vpack.c.bf16 %v75_v44, %v74_v43  ;;  %v58_v47 = vld [vmem:[#allocation5 + $0x70] sm:$0xff]  ;;  %v59_v48 = vld [vmem:[#allocation5 + $0x78] sm:$0xff]  ;;  %v40_v50 = vld [vmem:[#allocation2] sm:$0xff] }
  0x33   :  { %220 = vmatpush3.bf16.msra.mxu0 %v219_v19  ;;  %251 = vmatpush3.bf16.msra.mxu1 %v219_v19  ;;  %v239_v49 = vpack.c.bf16 %v59_v48, %v58_v47  ;;  %v42_v51 = vld [vmem:[#allocation2 + $0x10] sm:$0xff] }
  0x34   :  { %222 = vmatprep.subr.bf16.mxu0 %v221_v20  ;;  %244 = vmatprep.subr.bf16.mxu1 %v221_v20 }
  0x37   :  { %224 = vmatpush3.bf16.msra.mxu0 %v223_v27  ;;  %252 = vmatpush3.bf16.msra.mxu1 %v223_v27 }
  0x38   :  { %226 = vmatprep.subr.bf16.mxu0 %v225_v28  ;;  %245 = vmatprep.subr.bf16.mxu1 %v225_v28 }
  0x3b   :  { %228 = vmatpush3.bf16.msra.mxu0 %v227_v33  ;;  %253 = vmatpush3.bf16.msra.mxu1 %v227_v33 }
  0x3c   :  { %230 = vmatprep.subr.bf16.mxu0 %v229_v34  ;;  %246 = vmatprep.subr.bf16.mxu1 %v229_v34 }
  0x3f   :  { %232 = vmatpush3.bf16.msra.mxu0 %v231_v39  ;;  %254 = vmatpush3.bf16.msra.mxu1 %v231_v39 }
  0x40   :  { %234 = vmatprep.subr.bf16.mxu0 %v233_v40  ;;  %247 = vmatprep.subr.bf16.mxu1 %v233_v40 }
  0x43   :  { %236 = vmatpush3.bf16.msra.mxu0 %v235_v45  ;;  %255 = vmatpush3.bf16.msra.mxu1 %v235_v45 }
  0x44   :  { %238 = vmatprep.subr.bf16.mxu0 %v237_v46  ;;  %248 = vmatprep.subr.bf16.mxu1 %v237_v46 }
  0x47   :  { %240 = vmatpush3.bf16.msra.mxu0 %v239_v49  ;;  %256 = vmatpush3.bf16.msra.mxu1 %v239_v49 }
  0x4a   :  { %141 = vmatmul.mubr.f32.vlgmr.msra.gmra.mrb[0].mxu0 %v40_v50  ;;  %146 = vmatmul.mubr.f32.vlgmr.msra.gmra.mrb[0].mxu1 %v42_v51 }
 0x11d   :  { %v203_v52 = vpop.f32.mrb[0].mxu0  ;;  %v206_v53 = vpop.f32.mrb[0].mxu1 }
 0x11e   :  { %v204_v54 = vpop.f32.mrb[1].mxu0  ;;  %v207_v55 = vpop.f32.mrb[1].mxu1 }
 0x11f   :  { %v205_v56 = vadd.f32 %v204_v54, %v203_v52  ;;  %v208_v57 = vadd.f32 %v207_v55, %v206_v53 }
 0x121   :  { %151 = vst [vmem:[#allocation7] sm:$0xff] %v205_v56  ;;  %152 = vst [vmem:[#allocation7 + $0x8] sm:$0xff] %v208_v57 }
 0x122   :  { %319 = shalt.err (!%p316_p6)
}
 0x123   :  { %s320_s12 = scalar_lea.hbm %s402_s2, 256 }
 0x124   :  { %p321_p7 = scmp.ne.s32.totalorder %s402_s2, %s320_s12  ;;  %p324_p8 = scmp.lt.u32.totalorder %s320_s12, %s402_s2 }
 0x126   :  { %p326_p9 = pnand %p324_p8, %p321_p7 }
 0x128   :  { %329 = shalt.err (!%p326_p9)
}
 0x129   :  { %164 = dma.vmem_to_hbm [thread:$0]  %s159_s8, 256, %s402_s2, [#allocation4], %s340_s0, %s340_s0, %s341_s5  }
 0x12a   :  { %334 = dma.done.wait [#allocation4], 256  }
 0x12b   :  { %335 = vsyncadd [#allocation4], 4294967040 }
 0x12c   :  { %168 = vsyncpa [#allocation3], 1 }
 0x12d   :  { %169 = vsyncpa [#allocation6], 1 }
 0x12e   :  { %170 = vsyncpa [#allocation4], 1 }

</bundles_post_ra>
